<compile_context>
chip_gen: v7x
topology: tpu7x:2x2x1
jax: 0.10.0
libtpu: 0.0.40
codegen_flags: <defaults>
</compile_context>

<pallas_src>
import jax
import jax.numpy as jnp
from jax.experimental import pallas as pl
from jax.experimental.pallas import tpu as pltpu


def _pos_embed_kernel(x_ref, row0_ref, pos_rest_ref, o_ref):
    # x_ref:        (TB, N*D)      batch tile of patch embeddings (flattened tokens)
    # row0_ref:     (1,  D)        precomputed class_token + position_embedding[:, 0]
    # pos_rest_ref: (1,  N*D)      position_embedding[:, 1:] (flattened, resident)
    # o_ref:        (TB, (N+1)*D)  output batch tile (flattened tokens)
    tb = o_ref.shape[0]
    d = row0_ref.shape[1]

    # Class row for every batch element: broadcast the precomputed (class + pos[0]) row.
    o_ref[:, :d] = jnp.broadcast_to(row0_ref[...], (tb, d))

    # Patch rows: one aligned load/add over the whole batch tile, stored at lane offset D.
    o_ref[:, d:] = x_ref[...] + pos_rest_ref[...]


def _pick_batch_tile(batch: int, bytes_per_batch_elem: int, vmem_budget_bytes: int) -> int:
    """Largest divisor of `batch` whose double-buffered tiles fit the VMEM budget.

    Prefers divisors that are multiples of 8 (sublane-aligned block rows); falls back to the
    largest fitting divisor otherwise.  Always returns a divisor of `batch`.
    """
    cap = max(1, vmem_budget_bytes // (2 * bytes_per_batch_elem))  # x2 for double-buffering
    if batch <= cap:
        return batch
    best_any, best_aligned = 1, None
    for cand in range(1, min(batch, cap) + 1):
        if batch % cand == 0:
            best_any = cand
            if cand % 8 == 0:
                best_aligned = cand
    return best_aligned if best_aligned is not None else best_any


def positional_embedding(x: jax.Array,
                         class_token: jax.Array,
                         position_embedding: jax.Array,
                         *,
                         vmem_budget_bytes: int = 12 << 20) -> jax.Array:
    """x: (B, N, D); class_token: (1, 1, D); position_embedding: (1, N+1, D) -> (B, N+1, D)."""
    B, N, D = x.shape
    assert class_token.shape == (1, 1, D)
    assert position_embedding.shape == (1, N + 1, D)

    # Hoist batch-invariant work out of the per-step path (one tiny fused XLA op per call).
    row0 = (class_token + position_embedding[:, :1, :]).astype(x.dtype).reshape(1, D)
    pos_rest = position_embedding[:, 1:, :].astype(x.dtype).reshape(1, N * D)

    # Lane-dense 2-D views: tokens x features flattened into the lane axis.
    x2 = x.reshape(B, N * D)

    # Batch-tile size: largest divisor of B whose (x + out) tiles, double-buffered, stay
    # within a conservative VMEM budget (safe under v7x's 32 MiB scoped default).
    itemsize = jnp.dtype(x.dtype).itemsize
    bytes_per_b = (N + (N + 1)) * D * itemsize
    tb = _pick_batch_tile(B, bytes_per_b, vmem_budget_bytes)
    grid = (B // tb,)

    out2 = pl.pallas_call(
        _pos_embed_kernel,
        out_shape=jax.ShapeDtypeStruct((B, (N + 1) * D), x.dtype),
        grid_spec=pltpu.PrefetchScalarGridSpec(
            num_scalar_prefetch=0,
            grid=grid,
            in_specs=[
                pl.BlockSpec((tb, N * D), lambda b: (b, 0)),        # x: per-step batch tile
                pl.BlockSpec((1, D), lambda b: (0, 0)),             # row0: resident
                pl.BlockSpec((1, N * D), lambda b: (0, 0)),         # pos[1:]: resident
            ],
            out_specs=pl.BlockSpec((tb, (N + 1) * D), lambda b: (b, 0)),
        ),
        compiler_params=pltpu.CompilerParams(
            dimension_semantics=("parallel",)),
    )(x2, row0, pos_rest)

    return out2.reshape(B, N + 1, D)


if __name__ == "__main__":
    # Small shapes consistent with the module's forward contract.
    B, N, D = 2, 8, 32  # batch, num_patches, embedding_dim

    key = jax.random.PRNGKey(0)
    k_x, k_cls, k_pos = jax.random.split(key, 3)

    x = jax.random.normal(k_x, (B, N, D), dtype=jnp.float32)
    class_token = jax.random.normal(k_cls, (1, 1, D), dtype=jnp.float32)
    position_embedding = jax.random.normal(k_pos, (1, N + 1, D), dtype=jnp.float32)

    out = positional_embedding(x, class_token, position_embedding)
    out = jax.block_until_ready(out)

    # Pure-JAX reference.
    ref = jnp.concatenate(
        [jnp.broadcast_to(class_token, (B, 1, D)), x], axis=1) + position_embedding
    assert out.shape == (B, N + 1, D)
    assert jnp.allclose(out, ref, atol=1e-6, rtol=1e-6)

    print("KERNEL_OK")
</pallas_src>

<mosaic_0001>
module attributes {stable_mosaic.version = 11 : i64} {
  func.func @_pos_embed_kernel(%arg0: i32, %arg1: memref<2x256xf32, #tpu.memory_space<vmem>>, %arg2: memref<1x32xf32, #tpu.memory_space<vmem>>, %arg3: memref<1x256xf32, #tpu.memory_space<vmem>>, %arg4: memref<2x288xf32, #tpu.memory_space<vmem>>) attributes {dimension_semantics = [#tpu.dimension_semantics<parallel>], iteration_bounds = array<i64: 1>, scalar_prefetch = 0 : i64, scratch_operands = 0 : i64, tpu.core_type = #tpu.core_type<tc>, window_params = [{transform_indices = @transform_0, window_bounds = array<i64: 2, 256>}, {pipeline_mode = #tpu.pipeline_mode<synchronous>, transform_indices = @transform_1, window_bounds = array<i64: 1, 32>}, {pipeline_mode = #tpu.pipeline_mode<synchronous>, transform_indices = @transform_2, window_bounds = array<i64: 1, 256>}, {transform_indices = @transform_3, window_bounds = array<i64: 2, 288>}]} {
    %c0 = arith.constant 0 : index
    %c0_0 = arith.constant 0 : index
    %0 = vector.load %arg2[%c0, %c0_0] : memref<1x32xf32, #tpu.memory_space<vmem>>, vector<1x32xf32>
    %1 = vector.shape_cast %0 : vector<1x32xf32> to vector<1x32xf32>
    %2 = vector.broadcast %1 : vector<1x32xf32> to vector<2x32xf32>
    %c0_1 = arith.constant 0 : index
    %c0_2 = arith.constant 0 : index
    %3 = vector.load %arg4[%c0_1, %c0_2] : memref<2x288xf32, #tpu.memory_space<vmem>>, vector<2x32xf32>
    tpu.vector_store %arg4[%c0_1, %c0_2], %2 {strides = array<i32>} : memref<2x288xf32, #tpu.memory_space<vmem>>, vector<2x32xf32>,
    %c0_3 = arith.constant 0 : index
    %c0_4 = arith.constant 0 : index
    %4 = vector.load %arg1[%c0_3, %c0_4] : memref<2x256xf32, #tpu.memory_space<vmem>>, vector<2x256xf32>
    %c0_5 = arith.constant 0 : index
    %c0_6 = arith.constant 0 : index
    %5 = vector.load %arg3[%c0_5, %c0_6] : memref<1x256xf32, #tpu.memory_space<vmem>>, vector<1x256xf32>
    %6 = vector.broadcast %5 : vector<1x256xf32> to vector<2x256xf32>
    %7 = arith.addf %4, %6 : vector<2x256xf32>
    %c0_7 = arith.constant 0 : index
    %c32 = arith.constant 32 : index
    %8 = vector.load %arg4[%c0_7, %c32] : memref<2x288xf32, #tpu.memory_space<vmem>>, vector<2x256xf32>
    tpu.vector_store %arg4[%c0_7, %c32], %7 {strides = array<i32>} : memref<2x288xf32, #tpu.memory_space<vmem>>, vector<2x256xf32>,
    return
  }
  func.func @transform_0(%arg0: i32) -> (i32, i32) {
    %c0_i32 = arith.constant 0 : i32
    %c0_i32_0 = arith.constant 0 : i32
    return %arg0, %c0_i32 : i32, i32
  }
  func.func @transform_1(%arg0: i32) -> (i32, i32) {
    %c0_i32 = arith.constant 0 : i32
    %c0_i32_0 = arith.constant 0 : i32
    %c0_i32_1 = arith.constant 0 : i32
    return %c0_i32, %c0_i32_0 : i32, i32
  }
  func.func @transform_2(%arg0: i32) -> (i32, i32) {
    %c0_i32 = arith.constant 0 : i32
    %c0_i32_0 = arith.constant 0 : i32
    %c0_i32_1 = arith.constant 0 : i32
    return %c0_i32, %c0_i32_0 : i32, i32
  }
  func.func @transform_3(%arg0: i32) -> (i32, i32) {
    %c0_i32 = arith.constant 0 : i32
    %c0_i32_0 = arith.constant 0 : i32
    return %arg0, %c0_i32 : i32, i32
  }
}

</mosaic_0001>

<bundles_post_ra>
// kernel: tpu_custom_call.1
= control target key start
LH: loop header
LB: loop body
LE: loop exit
PB: predicated region body
PF: predicated region fallthrough
CT: control target
= control target key end

     0   :  { %8 = vsyncpa [#allocation3], 0  ;;  %s192_s0 = inlined_call_operand.hbm [shape: f32[2,256], index: 0, kind: input, shape index: {}]   ;;  %s193_s1 = inlined_call_operand.vmem [shape: f32[1,32], index: 1, kind: input, shape index: {}]   ;;  %s194_s2 = inlined_call_operand.vmem [shape: f32[1,256], index: 2, kind: input, shape index: {}]   ;;  %s195_s3 = inlined_call_operand.hbm [shape: f32[2,288], index: 3, kind: output, shape index: {}]  }
   0x1   :  { %9 = vsyncpa [#allocation4], 0  ;;  %s138_s12 = smov [#allocation2]   ;;  %s90_s16 = scalar_lea.hbm %s192_s0, 64 }
   0x2   :  { %s16_s13 = sshll.u32 %s138_s12, 4  ;;  %p91_p0 = scmp.ne.s32.totalorder %s192_s0, %s90_s16  ;;  %s17_s13 = int_to_ptr.vmem [resolvable:$true] %s16_s13 }
   0x3   :  { %p94_p1 = scmp.lt.u32.totalorder %s90_s16, %s192_s0 }
   0x5   :  { %p96_p2 = pnand %p94_p1, %p91_p0 }
   0x7   :  { %99 = shalt.err (!%p96_p2)
}
   0x8   :  { %s100_s21 = scalar_lea.vmem %s17_s13, 64  ;;  %p105_p4 = scmp.lt.s32.totalorder %s17_s13, %s17_s13 }
   0x9   :  { %p101_p3 = scmp.ne.s32.totalorder %s17_s13, %s100_s21  ;;  %p106_p5 = scmp.lt.s32.totalorder %s100_s21, %s100_s21 }
   0xb   :  { %p107_p6 = por %p106_p5, %p105_p4 }
   0xd   :  { %p108_p7 = pnand %p107_p6, %p101_p3 }
   0xf   :  { %111 = shalt.err (!%p108_p7)
}
  0x10   :  { %19 = dma.hbm_to_vmem [thread:$0]  %s192_s0, 64, %s17_s13, [#allocation3]  }
  0x11   :  { %134 = dma.done.wait [#allocation3], 64  }
  0x12   :  { %135 = vsyncadd [#allocation3], 4294967232  ;;  %v39_v0 = vlaneseq  ;;  %v139_v1 = vmov 1983009808   ;;  %vm34_vm0 = vcmask 254976   ;;  %s140_s0 = smov 32  }
  0x13   :  { %v49_v2 = vunpack.c.l.s4 %v139_v1  ;;  %v37_v7 = vld [vmem:[%s194_s2] sm:$0x3]  ;;  %vm64_vm1 = vcmask 1041664   ;;  %vm65_vm2 = vcmask 1043458   ;;  %vm67_vm4 = vcmask 259076   ;;  %s141_s28 = smov [#allocation5]  }
  0x14   :  { %v40_v3 = vshrl.u32 %v39_v0, 7  ;;  %v85_v8 = vld [vmem:[%s193_s1] ss:$0 sm:$0xff]  ;;  %vm66_vm3 = vmor %vm65_vm2, %vm64_vm1  ;;  %s76_s2 = sshll.u32 %s141_s28, 4  ;;  %vm61_vm5 = vcmask 261120   ;;  %s77_s2 = int_to_ptr.vmem [resolvable:$true] %s76_s2 }
  0x15   :  { %v50_v6 = vunpack.c.0.s8 %v49_v2  ;;  %35 = vst.msk [vmem:[#allocation5] sm:$0x3] %vm34_vm0, %v85_v8  ;;  %v36_v13 = vld [vmem:[#allocation2] sm:$0xf]  ;;  %vm68_vm6 = vmor %vm67_vm4, %vm66_vm3  ;;  %s112_s1 = scalar_lea.vmem %s77_s2, 96  ;;  %p117_p9 = scmp.lt.s32.totalorder %s77_s2, %s77_s2 }
  0x16   :  { %v41_v4 = vsub.s32 0, %v40_v3  ;;  %v45_v5 = vsub.s32 1, %v40_v3  ;;  %p113_p8 = scmp.ne.s32.totalorder %s77_s2, %s112_s1  ;;  %p118_p10 = scmp.lt.s32.totalorder %s112_s1, %s112_s1 }
  0x17   :  { %v53_v11 = vsub.s32 %v50_v6, %v40_v3 }
  0x18   :  { %v42_v9 = vrot.slane %v37_v7, %v41_v4  ;;  %v46_v10 = vrot.slane %v37_v7, %v45_v5  ;;  %p119_p11 = por %p118_p10, %p117_p9 }
  0x1a   :  { %v47_v12 = vcombine.low %v42_v9, %v46_v10  ;;  %p120_p12 = pnand %p119_p11, %p113_p8 }
  0x1c   :  { %v54_v14 = vrot.slane %v47_v12, %v53_v11 }
  0x1e   :  { %v56_v15 = vadd.f32 %v54_v14, %v36_v13 }
  0x20   :  { %58 = vrot.lane.b32.xlu0 %v56_v15, %s140_s0 }
  0x92   :  { %v59_v16 = vpop.permute.xlu0 %58 }
  0x93   :  { %v60_v17 = vrot.slane %v59_v16, 6 }
  0x95   :  { %v62_v18 = vsel %vm61_vm5, %v60_v17, %v59_v16 }
  0x96   :  { %69 = vst.msk [vmem:[#allocation5] sm:$0x3f] %vm68_vm6, %v62_v18 }
  0x97   :  { %123 = shalt.err (!%p120_p12)
}
  0x98   :  { %s124_s4 = scalar_lea.hbm %s195_s3, 96 }
  0x99   :  { %p125_p13 = scmp.ne.s32.totalorder %s195_s3, %s124_s4  ;;  %p128_p0 = scmp.lt.u32.totalorder %s124_s4, %s195_s3 }
  0x9b   :  { %p130_p1 = pnand %p128_p0, %p125_p13 }
  0x9d   :  { %133 = shalt.err (!%p130_p1)
}
  0x9e   :  { %79 = dma.vmem_to_hbm [thread:$0]  %s77_s2, 96, %s195_s3, [#allocation4]  }
  0x9f   :  { %136 = dma.done.wait [#allocation4], 96  }
  0xa0   :  { %137 = vsyncadd [#allocation4], 4294967200 }
  0xa1   :  { %83 = vsyncpa [#allocation3], 1 }
  0xa2   :  { %84 = vsyncpa [#allocation4], 1 }

</bundles_post_ra>
